<compile_context>
chip_gen: v5e
topology: v5e:2x2
jax: 0.10.0
libtpu: 0.0.40
codegen_flags: <defaults>
</compile_context>

<pallas_src>
import jax
import jax.numpy as jnp
from jax.experimental import pallas as pl
from jax.experimental.pallas import tpu as pltpu


def _log_map_kernel(x_ref, y_ref, o_ref):
    # Euclidean logarithm map: log_x(y) = y - x  (pure elementwise, VPU).
    o_ref[...] = y_ref[...] - x_ref[...]


_LANE_CANDIDATES = (2048, 1024, 512, 256, 128)
_TARGET_BLOCK_BYTES = 1 << 20  # ~1 MiB per array per grid step


def _pick_2d_layout(total: int, last_dim: int):
    """Lane-dense (rows, lanes) factorization of the flat element count."""
    for lane in _LANE_CANDIDATES:
        if total % lane == 0:
            return total // lane, lane
    # Rare fallback (total not divisible by 128): keep original last dim on lanes.
    return total // last_dim, last_dim


def euclidean_logarithm(x: jax.Array, y: jax.Array, *, min_pallas_elements: int = 65536) -> jax.Array:
    """Pallas implementation of EuclideanLogarithm.forward(x, y) = y - x."""
    assert x.shape == y.shape, (x.shape, y.shape)
    assert x.dtype == y.dtype, (x.dtype, y.dtype)
    orig_shape = x.shape
    dtype = x.dtype
    itemsize = jnp.dtype(dtype).itemsize
    total = 1
    for s in orig_shape:
        total *= s

    # Tiny inputs: pallas_call launch + DMA setup dwarfs the subtraction itself.
    if x.ndim == 0 or total < min_pallas_elements:
        return y - x

    rows, lanes = _pick_2d_layout(total, orig_shape[-1])
    x2 = x.reshape(rows, lanes)
    y2 = y.reshape(rows, lanes)

    # Sublane packing: 8 rows/vreg for 32-bit dtypes, 16 for 16-bit, 32 for 8-bit.
    sublane = max(8, 32 // itemsize)
    tile_r = max(sublane, _TARGET_BLOCK_BYTES // (lanes * itemsize))
    tile_r = (tile_r // sublane) * sublane
    if tile_r >= rows:
        tile_r = rows  # single full-array block (exempt from (8,128) alignment)

    grid = (pl.cdiv(rows, tile_r),)

    out2 = pl.pallas_call(
        _log_map_kernel,
        out_shape=jax.ShapeDtypeStruct((rows, lanes), dtype),
        grid_spec=pltpu.PrefetchScalarGridSpec(
            num_scalar_prefetch=0,
            grid=grid,
            in_specs=[
                pl.BlockSpec((tile_r, lanes), lambda i: (i, 0)),
                pl.BlockSpec((tile_r, lanes), lambda i: (i, 0)),
            ],
            out_specs=pl.BlockSpec((tile_r, lanes), lambda i: (i, 0)),
        ),
        compiler_params=pltpu.CompilerParams(
            dimension_semantics=("parallel",),
        ),
        cost_estimate=pl.CostEstimate(
            flops=total,
            transcendentals=0,
            bytes_accessed=3 * total * itemsize,
        ),
    )(x2, y2)

    return out2.reshape(orig_shape)


if __name__ == "__main__":
    dim = 32
    key = jax.random.PRNGKey(0)
    kx, ky, ka, kb = jax.random.split(key, 4)

    # Small demo shape consistent with the module (batch=2, seq=8, dim=32).
    # Force the Pallas path so the kernel is exercised even at this size.
    x_s = jax.random.normal(kx, (2, 8, dim), dtype=jnp.float32)
    y_s = jax.random.normal(ky, (2, 8, dim), dtype=jnp.float32)
    out_s = euclidean_logarithm(x_s, y_s, min_pallas_elements=0)
    jax.block_until_ready(out_s)
    ref_s = y_s - x_s
    assert out_s.shape == ref_s.shape and out_s.dtype == ref_s.dtype
    assert jnp.allclose(out_s, ref_s, atol=1e-6, rtol=1e-6)

    # Larger input: exercises the lane-dense, multi-step pipelined path
    # (L=2048, ~1 MiB blocks, 4 parallel grid steps).
    x_l = jax.random.normal(ka, (16, 2048, dim), dtype=jnp.float32)
    y_l = jax.random.normal(kb, (16, 2048, dim), dtype=jnp.float32)
    out_l = euclidean_logarithm(x_l, y_l)
    jax.block_until_ready(out_l)
    ref_l = y_l - x_l
    assert out_l.shape == ref_l.shape and out_l.dtype == ref_l.dtype
    assert jnp.allclose(out_l, ref_l, atol=1e-6, rtol=1e-6)

    print("KERNEL_OK")
</pallas_src>

<mosaic_0001>
module attributes {stable_mosaic.version = 11 : i64} {
  func.func @_log_map_kernel(%arg0: i32, %arg1: memref<1x512xf32, #tpu.memory_space<vmem>>, %arg2: memref<1x512xf32, #tpu.memory_space<vmem>>, %arg3: memref<1x512xf32, #tpu.memory_space<vmem>>) attributes {dimension_semantics = [#tpu.dimension_semantics<parallel>], iteration_bounds = array<i64: 1>, scalar_prefetch = 0 : i64, scratch_operands = 0 : i64, tpu.core_type = #tpu.core_type<tc>, window_params = [{transform_indices = @transform_0, window_bounds = array<i64: 1, 512>}, {transform_indices = @transform_1, window_bounds = array<i64: 1, 512>}, {transform_indices = @transform_2, window_bounds = array<i64: 1, 512>}]} {
    %c0 = arith.constant 0 : index
    %c0_0 = arith.constant 0 : index
    %0 = vector.load %arg2[%c0, %c0_0] : memref<1x512xf32, #tpu.memory_space<vmem>>, vector<1x512xf32>
    %c0_1 = arith.constant 0 : index
    %c0_2 = arith.constant 0 : index
    %1 = vector.load %arg1[%c0_1, %c0_2] : memref<1x512xf32, #tpu.memory_space<vmem>>, vector<1x512xf32>
    %2 = arith.subf %0, %1 : vector<1x512xf32>
    %c0_3 = arith.constant 0 : index
    %c0_4 = arith.constant 0 : index
    %3 = vector.load %arg3[%c0_3, %c0_4] : memref<1x512xf32, #tpu.memory_space<vmem>>, vector<1x512xf32>
    tpu.vector_store %arg3[%c0_3, %c0_4], %2 {strides = array<i32>} : memref<1x512xf32, #tpu.memory_space<vmem>>, vector<1x512xf32>,
    return
  }
  func.func @transform_0(%arg0: i32) -> (i32, i32) {
    %c0_i32 = arith.constant 0 : i32
    %c0_i32_0 = arith.constant 0 : i32
    return %arg0, %c0_i32 : i32, i32
  }
  func.func @transform_1(%arg0: i32) -> (i32, i32) {
    %c0_i32 = arith.constant 0 : i32
    %c0_i32_0 = arith.constant 0 : i32
    return %arg0, %c0_i32 : i32, i32
  }
  func.func @transform_2(%arg0: i32) -> (i32, i32) {
    %c0_i32 = arith.constant 0 : i32
    %c0_i32_0 = arith.constant 0 : i32
    return %arg0, %c0_i32 : i32, i32
  }
}

</mosaic_0001>

<bundles_post_ra>
// kernel: tpu_custom_call.1
= control target key start
LH: loop header
LB: loop body
LE: loop exit
PB: predicated region body
PF: predicated region fallthrough
CT: control target
= control target key end

     0   :  { %7 = vsyncpa [#allocation3], 0  ;;  %s174_s0 = inlined_call_operand.hbm [shape: f32[1,512], index: 0, kind: input, shape index: {}]   ;;  %s175_s1 = inlined_call_operand.hbm [shape: f32[1,512], index: 1, kind: input, shape index: {}]   ;;  %s176_s2 = inlined_call_operand.hbm [shape: f32[1,512], index: 2, kind: output, shape index: {}]  }
   0x1   :  { %8 = vsyncpa [#allocation6], 0 }
   0x2   :  { %9 = vsyncpa [#allocation4], 0  ;;  %s15_s11 = sshll.u32 %s174_s0, 4  ;;  %s147_s12 = smov [#allocation2]   ;;  %s16_s11 = int_to_ptr.hbm [resolvable:$true] %s15_s11 }
   0x3   :  { %s17_s13 = sshll.u32 %s147_s12, 4  ;;  %s26_s16 = sshll.u32 %s175_s1, 4  ;;  %s18_s13 = int_to_ptr.vmem [resolvable:$true] %s17_s13  ;;  %s27_s16 = int_to_ptr.hbm [resolvable:$true] %s26_s16 }
   0x4   :  { %20 = dma.hbm_to_vmem [thread:$0]  %s16_s11, 64, %s18_s13, [#allocation3]  }
   0x5   :  { %s148_s17 = smov [#allocation5]  }
   0x6   :  { %s28_s18 = sshll.u32 %s148_s17, 4  ;;  %s29_s18 = int_to_ptr.vmem [resolvable:$true] %s28_s18 }
   0x7   :  { %31 = dma.hbm_to_vmem [thread:$0]  %s27_s16, 64, %s29_s18, [#allocation6]  }
   0x8   :  { %141 = dma.done.wait [#allocation3], 64  }
   0x9   :  { %142 = vsyncadd [#allocation3], 4294967232 }
   0xa   :  { %143 = dma.done.wait [#allocation6], 64  }
   0xb   :  { %144 = vsyncadd [#allocation6], 4294967232  ;;  %v43_v0 = vlaneseq  ;;  %s149_s0 = smov [#allocation7]   ;;  %s55_s22 = sshll.u32 %s176_s2, 4  ;;  %v40_v1 = vld [vmem:[#allocation5] sm:$0xf]  ;;  %s56_s22 = int_to_ptr.hbm [resolvable:$true] %s55_s22 }
   0xc   :  { %s53_s19 = sshll.u32 %s149_s0, 4  ;;  %v41_v2 = vld [vmem:[#allocation2] sm:$0xf]  ;;  %s54_s19 = int_to_ptr.vmem [resolvable:$true] %s53_s19 }
   0xd   :  { %vm45_vm0 = vcmp.lt.s32.totalorder %v43_v0, 512  ;;  %v42_v3 = vsub.f32 %v40_v1, %v41_v2 }
   0xf   :  { %47 = vst.msk [vmem:[#allocation7] sm:$0xf] %vm45_vm0, %v42_v3 }
  0x10   :  { %58 = dma.vmem_to_hbm [thread:$0]  %s54_s19, 64, %s56_s22, [#allocation4]  }
  0x11   :  { %145 = dma.done.wait [#allocation4], 64  }
  0x12   :  { %146 = vsyncadd [#allocation4], 4294967232 }
  0x13   :  { %63 = vsyncpa [#allocation3], 1 }
  0x14   :  { %64 = vsyncpa [#allocation6], 1 }
  0x15   :  { %65 = vsyncpa [#allocation4], 1 }

</bundles_post_ra>
